<compile_context>
chip_gen: v6e
topology: v6e:2x2x1
jax: 0.10.0
libtpu: 0.0.40
codegen_flags: <defaults>
</compile_context>

<pallas_src>
import jax
import jax.numpy as jnp
from jax.experimental import pallas as pl
from jax.experimental.pallas import tpu as pltpu

LN_EPS = 1e-5  # torch nn.LayerNorm default


def _round_up(a, b):
    return ((a + b - 1) // b) * b


def prenorm_linear_kernel(x_ref, w_ref, b_ref, o_ref):
    # x_ref block: (TM, D) rows of flattened (B*N, D) tokens.
    x = x_ref[...].astype(jnp.float32)                       # f32 statistics

    inv_d = jnp.float32(1.0 / x.shape[-1])
    mean = jnp.sum(x, axis=-1, keepdims=True) * inv_d        # (TM, 1)
    xc = x - mean
    var = jnp.sum(xc * xc, axis=-1, keepdims=True) * inv_d   # biased, >= 0
    xn = xc * jax.lax.rsqrt(var + LN_EPS)                    # (TM, D), f32

    # Affine-folded Linear: out = xn @ (gamma*W) + (beta@W + b)
    out = jnp.dot(xn.astype(w_ref.dtype), w_ref[...],
                  preferred_element_type=jnp.float32)        # MXU, f32 acc
    o_ref[...] = (out + b_ref[...]).astype(o_ref.dtype)


def fold_layernorm_into_linear(gamma, beta, w, wb):
    """Fold LayerNorm affine into the Linear. Call once per weight update."""
    w32 = w.astype(jnp.float32)
    w_folded = (gamma.astype(jnp.float32)[:, None] * w32).astype(jnp.bfloat16)
    b_folded = (beta.astype(jnp.float32)[None, :] @ w32
                + wb.astype(jnp.float32)[None, :])            # (1, D), f32
    return w_folded, b_folded


def prenorm_forward(x, w_folded, b_folded, *, tm=None):
    """PreNorm(LayerNorm(dim) -> Linear(dim, dim)) forward.

    x: (B, N, D); w_folded: (D, D) bf16; b_folded: (1, D) f32
    (from fold_layernorm_into_linear).
    """
    B, N, D = x.shape
    rows = B * N
    x2 = x.reshape(rows, D)
    itemsize = jnp.dtype(x.dtype).itemsize

    # --- Row tiling: target an x block of ~2 MiB (sweet spot of the measured
    # tiling curve), sublane-aligned, never larger than the (rounded) rows.
    if tm is None:
        target_bytes = 2 * 1024 * 1024
        tm = max(256, min(4096, target_bytes // (D * itemsize)))
    tm = max(8, (tm // 8) * 8)
    tm_eff = min(tm, _round_up(rows, 8))
    # If one step would cover everything but the tile is big, split in two so
    # the "parallel" axis can be sharded across v7x's two TensorCores.
    if rows <= tm_eff and tm_eff >= 1024:
        tm_eff = _round_up(pl.cdiv(rows, 2), 8)

    grid = (pl.cdiv(rows, tm_eff),)   # partial last block handled by Pallas

    # --- Raise the scoped-VMEM limit only when needed (v5e default is 16 MiB).
    x_blk = tm_eff * D * itemsize
    o_blk = tm_eff * D * itemsize
    w_blk = D * D * jnp.dtype(w_folded.dtype).itemsize
    b_blk = D * jnp.dtype(b_folded.dtype).itemsize
    footprint = 2 * (x_blk + o_blk + w_blk + b_blk)   # double-buffered specs
    compiler_kwargs = dict(dimension_semantics=("parallel",))
    if footprint > 12 * 1024 * 1024:
        compiler_kwargs["vmem_limit_bytes"] = min(
            64 * 1024 * 1024, _round_up(2 * footprint, 1024 * 1024))

    out = pl.pallas_call(
        prenorm_linear_kernel,
        out_shape=jax.ShapeDtypeStruct((rows, D), x.dtype),
        grid_spec=pltpu.PrefetchScalarGridSpec(
            num_scalar_prefetch=0,
            grid=grid,
            in_specs=[
                pl.BlockSpec((tm_eff, D), lambda i: (i, 0)),   # token rows
                pl.BlockSpec((D, D), lambda i: (0, 0)),        # folded weight
                pl.BlockSpec((1, D), lambda i: (0, 0)),        # folded bias
            ],
            out_specs=pl.BlockSpec((tm_eff, D), lambda i: (i, 0)),
        ),
        compiler_params=pltpu.CompilerParams(**compiler_kwargs),
    )(x2, w_folded, b_folded)

    return out.reshape(B, N, D)


if __name__ == "__main__":
    # Small but lane-dense shapes: D = 128 so output stores use all 128 lanes.
    B, N, D = 2, 8, 128  # batch, num_tokens, dim

    key = jax.random.PRNGKey(0)
    kx, kw, kb, kg, kbe = jax.random.split(key, 5)

    x = jax.random.normal(kx, (B, N, D), dtype=jnp.float32)

    # Non-trivial LayerNorm affine params (exercise the affine fold).
    gamma = 1.0 + 0.1 * jax.random.normal(kg, (D,), dtype=jnp.float32)
    beta = 0.05 * jax.random.normal(kbe, (D,), dtype=jnp.float32)

    # Deterministic weights for the wrapped fn (Linear(dim, dim)).
    w = jax.random.normal(kw, (D, D), dtype=jnp.float32) * (1.0 / jnp.sqrt(D))
    wb = jax.random.normal(kb, (D,), dtype=jnp.float32) * 0.01

    # Fold once (per weight update), reuse across forwards.
    w_folded, b_folded = fold_layernorm_into_linear(gamma, beta, w, wb)
    w_folded = jax.block_until_ready(w_folded)
    b_folded = jax.block_until_ready(b_folded)

    out = prenorm_forward(x, w_folded, b_folded)
    out = jax.block_until_ready(out)

    # Reference in plain JAX (full f32 math). The kernel runs the matmul with
    # bf16 operands / f32 accumulation, so compare with bf16-level tolerance.
    mean = jnp.mean(x, axis=-1, keepdims=True)
    var = jnp.mean((x - mean) ** 2, axis=-1, keepdims=True)
    xn = (x - mean) / jnp.sqrt(var + LN_EPS)
    y_ref = xn * gamma + beta
    ref = jnp.einsum("bnd,de->bne", y_ref, w) + wb

    assert out.shape == (B, N, D)
    assert jnp.allclose(out, ref, atol=3e-2, rtol=3e-2), (
        "mismatch vs reference; max abs err = "
        f"{float(jnp.max(jnp.abs(out - ref)))}"
    )

    print("KERNEL_OK")
</pallas_src>

<mosaic_0001>
module attributes {stable_mosaic.version = 11 : i64} {
  func.func @prenorm_linear_kernel(%arg0: i32, %arg1: memref<16x128xf32, #tpu.memory_space<vmem>>, %arg2: memref<128x128xbf16, #tpu.memory_space<vmem>>, %arg3: memref<1x128xf32, #tpu.memory_space<vmem>>, %arg4: memref<16x128xf32, #tpu.memory_space<vmem>>) attributes {dimension_semantics = [#tpu.dimension_semantics<parallel>], iteration_bounds = array<i64: 1>, scalar_prefetch = 0 : i64, scratch_operands = 0 : i64, tpu.core_type = #tpu.core_type<tc>, window_params = [{transform_indices = @transform_0, window_bounds = array<i64: 16, 128>}, {pipeline_mode = #tpu.pipeline_mode<synchronous>, transform_indices = @transform_1, window_bounds = array<i64: 128, 128>}, {pipeline_mode = #tpu.pipeline_mode<synchronous>, transform_indices = @transform_2, window_bounds = array<i64: 1, 128>}, {transform_indices = @transform_3, window_bounds = array<i64: 16, 128>}]} {
    %c0 = arith.constant 0 : index
    %c0_0 = arith.constant 0 : index
    %0 = vector.load %arg1[%c0, %c0_0] : memref<16x128xf32, #tpu.memory_space<vmem>>, vector<16x128xf32>
    %cst = arith.constant dense<0.000000e+00> : vector<16xf32>
    %1 = vector.multi_reduction <add>, %0, %cst [1] : vector<16x128xf32> to vector<16xf32>
    %2 = vector.shape_cast %1 : vector<16xf32> to vector<16x1xf32>
    %cst_1 = arith.constant 7.812500e-03 : f32
    %3 = vector.broadcast %cst_1 : f32 to vector<16x1xf32>
    %4 = arith.mulf %2, %3 : vector<16x1xf32>
    %5 = vector.broadcast %4 : vector<16x1xf32> to vector<16x128xf32>
    %6 = arith.subf %0, %5 : vector<16x128xf32>
    %7 = arith.mulf %6, %6 : vector<16x128xf32>
    %cst_2 = arith.constant dense<0.000000e+00> : vector<16xf32>
    %8 = vector.multi_reduction <add>, %7, %cst_2 [1] : vector<16x128xf32> to vector<16xf32>
    %9 = vector.shape_cast %8 : vector<16xf32> to vector<16x1xf32>
    %cst_3 = arith.constant 7.812500e-03 : f32
    %10 = vector.broadcast %cst_3 : f32 to vector<16x1xf32>
    %11 = arith.mulf %9, %10 : vector<16x1xf32>
    %cst_4 = arith.constant 9.99999974E-6 : f32
    %12 = vector.broadcast %cst_4 : f32 to vector<16x1xf32>
    %13 = arith.addf %11, %12 : vector<16x1xf32>
    %14 = math.rsqrt %13 : vector<16x1xf32>
    %15 = vector.broadcast %14 : vector<16x1xf32> to vector<16x128xf32>
    %16 = arith.mulf %6, %15 : vector<16x128xf32>
    %17 = arith.truncf %16 : vector<16x128xf32> to vector<16x128xbf16>
    %c0_5 = arith.constant 0 : index
    %c0_6 = arith.constant 0 : index
    %18 = vector.load %arg2[%c0_5, %c0_6] : memref<128x128xbf16, #tpu.memory_space<vmem>>, vector<128x128xbf16>
    %cst_7 = arith.constant dense<0.000000e+00> : vector<16x128xf32>
    %19 = tpu.matmul %17, %18, %cst_7 {dimension_numbers = #tpu.dot_dimension_numbers<[1], [0], [0], [1], [0, 0, 1, 1], [], []>} : vector<16x128xbf16>, vector<128x128xbf16>, vector<16x128xf32> -> vector<16x128xf32>
    %c0_8 = arith.constant 0 : index
    %c0_9 = arith.constant 0 : index
    %20 = vector.load %arg3[%c0_8, %c0_9] : memref<1x128xf32, #tpu.memory_space<vmem>>, vector<1x128xf32>
    %21 = vector.broadcast %20 : vector<1x128xf32> to vector<16x128xf32>
    %22 = arith.addf %19, %21 : vector<16x128xf32>
    %c0_10 = arith.constant 0 : index
    %c0_11 = arith.constant 0 : index
    %23 = vector.load %arg4[%c0_10, %c0_11] : memref<16x128xf32, #tpu.memory_space<vmem>>, vector<16x128xf32>
    tpu.vector_store %arg4[%c0_10, %c0_11], %22 {strides = array<i32>} : memref<16x128xf32, #tpu.memory_space<vmem>>, vector<16x128xf32>,
    return
  }
  func.func @transform_0(%arg0: i32) -> (i32, i32) {
    %c0_i32 = arith.constant 0 : i32
    %c0_i32_0 = arith.constant 0 : i32
    return %arg0, %c0_i32 : i32, i32
  }
  func.func @transform_1(%arg0: i32) -> (i32, i32) {
    %c0_i32 = arith.constant 0 : i32
    %c0_i32_0 = arith.constant 0 : i32
    %c0_i32_1 = arith.constant 0 : i32
    return %c0_i32, %c0_i32_0 : i32, i32
  }
  func.func @transform_2(%arg0: i32) -> (i32, i32) {
    %c0_i32 = arith.constant 0 : i32
    %c0_i32_0 = arith.constant 0 : i32
    %c0_i32_1 = arith.constant 0 : i32
    return %c0_i32, %c0_i32_0 : i32, i32
  }
  func.func @transform_3(%arg0: i32) -> (i32, i32) {
    %c0_i32 = arith.constant 0 : i32
    %c0_i32_0 = arith.constant 0 : i32
    return %arg0, %c0_i32 : i32, i32
  }
}

</mosaic_0001>

<bundles_post_ra>
// kernel: tpu_custom_call.1
= control target key start
LH: loop header
LB: loop body
LE: loop exit
PB: predicated region body
PF: predicated region fallthrough
CT: control target
= control target key end

     0   :  { %8 = vsyncpa [#allocation3], 0  ;;  %s373_s0 = inlined_call_operand.hbm [shape: f32[16,128], index: 0, kind: input, shape index: {}]   ;;  %s374_s1 = inlined_call_operand.hbm [shape: bf16[128,128], index: 1, kind: input, shape index: {}]   ;;  %s375_s2 = inlined_call_operand.vmem [shape: f32[1,128], index: 2, kind: input, shape index: {}]   ;;  %s376_s3 = inlined_call_operand.hbm [shape: f32[16,128], index: 3, kind: output, shape index: {}]  }
   0x1   :  { %9 = vsyncpa [#allocation6], 0 }
   0x2   :  { %10 = vsyncpa [#allocation4], 0  ;;  %s326_s12 = smov [#allocation2]  }
   0x3   :  { %s16_s13 = sshll.u32 %s326_s12, 4  ;;  %s17_s13 = int_to_ptr.vmem [resolvable:$true] %s16_s13 }
   0x4   :  { %s268_s14 = scalar_lea.vmem %s17_s13, 256  ;;  %p273_p1 = scmp.lt.s32.totalorder %s17_s13, %s17_s13 }
   0x5   :  { %p269_p0 = scmp.ne.s32.totalorder %s17_s13, %s268_s14  ;;  %p274_p2 = scmp.lt.s32.totalorder %s268_s14, %s268_s14 }
   0x7   :  { %p275_p3 = por %p274_p2, %p273_p1 }
   0x9   :  { %p276_p4 = pnand %p275_p3, %p269_p0 }
   0xb   :  { %279 = shalt.err (!%p276_p4)
}
   0xc   :  { %s327_s15 = smov 128   ;;  %s328_s16 = smov 8  }
   0xd   :  { %22 = dma.hbm_to_vmem [thread:$0]  %s373_s0, 256, %s17_s13, [#allocation3], %s327_s15, %s327_s15, %s328_s16  }
   0xe   :  { %s329_s19 = smov [#allocation5]  }
   0xf   :  { %s28_s20 = sshll.u32 %s329_s19, 4  ;;  %s29_s20 = int_to_ptr.vmem [resolvable:$true] %s28_s20 }
  0x10   :  { %s288_s21 = scalar_lea.vmem %s29_s20, 1024  ;;  %p293_p6 = scmp.lt.s32.totalorder %s29_s20, %s29_s20 }
  0x11   :  { %p289_p5 = scmp.ne.s32.totalorder %s29_s20, %s288_s21  ;;  %p294_p7 = scmp.lt.s32.totalorder %s288_s21, %s288_s21 }
  0x13   :  { %p295_p8 = por %p294_p7, %p293_p6 }
  0x15   :  { %p296_p9 = pnand %p295_p8, %p289_p5 }
  0x17   :  { %299 = shalt.err (!%p296_p9)
}
  0x18   :  { %s330_s22 = smov 64   ;;  %s331_s23 = smov 4  }
  0x19   :  { %34 = dma.hbm_to_vmem [thread:$0]  %s374_s1, 1024, %s29_s20, [#allocation6], %s330_s22, %s330_s22, %s331_s23  }
  0x1a   :  { %320 = dma.done.wait [#allocation3], 256  }
  0x1b   :  { %321 = vsyncadd [#allocation3], 4294967040 }
  0x1c   :  { %322 = dma.done.wait [#allocation6], 1024  }
  0x1d   :  { %323 = vsyncadd [#allocation6], 4294966272  ;;  %v44_v0 = vld [vmem:[#allocation2] sm:$0xff]  ;;  %v45_v1 = vld [vmem:[#allocation2 + $0x8] sm:$0xff]  ;;  %v332_v3 = vmov 0.0   ;;  %vm333_vm0 = vmmov 0  }
  0x1e   :  { %46 = vadd.xlane.f32.xlu0 %v44_v0  ;;  %v248_v2 = vld [vmem:[#allocation5 + $0x38] sm:$0xff]   ;;  %219 = vmatprep.subr.bf16.mxu0 %v332_v3  ;;  %v249_v4 = vld [vmem:[#allocation5 + $0x30] sm:$0xff]   ;;  %v250_v13 = vld [vmem:[#allocation5 + $0x28] sm:$0xff]   ;;  %s334_s26 = smov [#allocation7]  }
  0x1f   :  { %220 = vmatpush3.bf16.msra.mxu0 %v248_v2  ;;  %v251_v14 = vld [vmem:[#allocation5 + $0x20] sm:$0xff]   ;;  %v252_v15 = vld [vmem:[#allocation5 + $0x18] sm:$0xff]   ;;  %235 = vmatprep.mubr.msk.bf16.mxu0 %vm333_vm0, %v332_v3  ;;  %v253_v16 = vld [vmem:[#allocation5 + $0x10] sm:$0xff]   ;;  %s188_s27 = sshll.u32 %s334_s26, 4  ;;  %s189_s27 = int_to_ptr.vmem [resolvable:$true] %s188_s27 }
  0x20   :  { %221 = vmatprep.subr.bf16.mxu0 %v332_v3  ;;  %v254_v17 = vld [vmem:[#allocation5 + $0x8] sm:$0xff]   ;;  %v255_v18 = vld [vmem:[#allocation5] sm:$0xff]   ;;  %v201_v30 = vld [vmem:[%s375_s2] ss:$0 sm:$0xff]  ;;  %s300_s28 = scalar_lea.vmem %s189_s27, 256  ;;  %p305_p11 = scmp.lt.s32.totalorder %s189_s27, %s189_s27 }
  0x21   :  { %p301_p10 = scmp.ne.s32.totalorder %s189_s27, %s300_s28  ;;  %p306_p12 = scmp.lt.s32.totalorder %s300_s28, %s300_s28 }
  0x22   :  { %48 = vadd.xlane.f32.xlu0 %v45_v1 }
  0x23   :  { %222 = vmatpush3.bf16.msra.mxu0 %v249_v4  ;;  %p307_p13 = por %p306_p12, %p305_p11 }
  0x24   :  { %223 = vmatprep.subr.bf16.mxu0 %v332_v3 }
  0x25   :  { %p308_p0 = pnand %p307_p13, %p301_p10 }
  0x27   :  { %224 = vmatpush3.bf16.msra.mxu0 %v250_v13 }
  0x28   :  { %225 = vmatprep.subr.bf16.mxu0 %v332_v3 }
  0x2b   :  { %226 = vmatpush3.bf16.msra.mxu0 %v251_v14 }
  0x2c   :  { %227 = vmatprep.subr.bf16.mxu0 %v332_v3 }
  0x2f   :  { %228 = vmatpush3.bf16.msra.mxu0 %v252_v15 }
  0x30   :  { %229 = vmatprep.subr.bf16.mxu0 %v332_v3 }
  0x33   :  { %230 = vmatpush3.bf16.msra.mxu0 %v253_v16 }
  0x34   :  { %231 = vmatprep.subr.bf16.mxu0 %v332_v3 }
  0x37   :  { %232 = vmatpush3.bf16.msra.mxu0 %v254_v17 }
  0x38   :  { %233 = vmatprep.subr.bf16.mxu0 %v332_v3 }
  0x3b   :  { %234 = vmatpush3.bf16.msra.mxu0 %v255_v18 }
  0xa7   :  { %v47_v5 = vpop.xlane.xlu0 %46 }
  0xa8   :  { %v50_v6 = vmul.f32 0.0078125, %v47_v5 }
  0xaa   :  { %v52_v7 = vsub.f32 %v44_v0, %v50_v6 }
  0xab   :  { %v49_v8 = vpop.xlane.xlu0 %48 }
  0xac   :  { %v51_v9 = vmul.f32 0.0078125, %v49_v8  ;;  %v54_v10 = vmul.f32 %v52_v7, %v52_v7 }
  0xae   :  { %v53_v11 = vsub.f32 %v45_v1, %v51_v9  ;;  %56 = vadd.xlane.f32.xlu1 %v54_v10 }
  0xb0   :  { %v55_v12 = vmul.f32 %v53_v11, %v53_v11 }
  0xb2   :  { %58 = vadd.xlane.f32.xlu1 %v55_v12 }
 0x137   :  { %v57_v19 = vpop.xlane.xlu1 %56 }
 0x138   :  { %v60_v20 = vmul.f32 0.0078125, %v57_v19 }
 0x13a   :  { %v62_v21 = vadd.f32 1e-05, %v60_v20 }
 0x13b   :  { %v59_v22 = vpop.xlane.xlu1 %58 }
 0x13c   :  { %v61_v23 = vmul.f32 0.0078125, %v59_v22  ;;  %256 = vrsqrt.f32 %v62_v21 }
 0x13e   :  { %v63_v24 = vadd.f32 1e-05, %v61_v23 }
 0x140   :  { %258 = vrsqrt.f32 %v63_v24 }
 0x149   :  { %v257_v25 = vpop.eup %256 }
 0x14a   :  { %v66_v27 = vmul.f32 %v257_v25, %v52_v7 }
 0x14d   :  { %v259_v26 = vpop.eup %258 }
 0x14e   :  { %v67_v28 = vmul.f32 %v259_v26, %v53_v11 }
 0x150   :  { %v68_v29 = vpack.c.bf16 %v67_v28, %v66_v27 }
 0x152   :  { %236 = vmatmul.mubr.bf16.vlgmr.msra.gmra.mxu0 %v68_v29 }
 0x212   :  { %v174_v31 = vpop.f32.mrf.mxu0 }
 0x213   :  { %v175_v32 = vadd.f32 %v201_v30, %v174_v31 }
 0x214   :  { %v237_v33 = vpop.f32.mrf.mxu0 }
 0x215   :  { %181 = vst [vmem:[#allocation7] sm:$0xff] %v175_v32 }
 0x216   :  { %v177_v34 = vpop.f32.mrf.mxu0 }
 0x217   :  { %v178_v35 = vadd.f32 %v201_v30, %v177_v34 }
 0x218   :  { %v238_v36 = vpop.f32.mrf.mxu0 }
 0x219   :  { %182 = vst [vmem:[#allocation7 + $0x8] sm:$0xff] %v178_v35 }
 0x21a   :  { %311 = shalt.err (!%p308_p0)
}
 0x21b   :  { %194 = dma.vmem_to_hbm [thread:$0]  %s189_s27, 256, %s376_s3, [#allocation4], %s327_s15, %s327_s15, %s328_s16  }
 0x21c   :  { %324 = dma.done.wait [#allocation4], 256  }
 0x21d   :  { %325 = vsyncadd [#allocation4], 4294967040 }
 0x21e   :  { %198 = vsyncpa [#allocation3], 1 }
 0x21f   :  { %199 = vsyncpa [#allocation6], 1 }
 0x220   :  { %200 = vsyncpa [#allocation4], 1 }

</bundles_post_ra>
